<compile_context>
chip_gen: v5e
topology: v5e:2x2
jax: 0.10.0
libtpu: 0.0.40
codegen_flags: <defaults>
</compile_context>

<pallas_src>
import functools

import jax
import jax.numpy as jnp
from jax.experimental import pallas as pl
from jax.experimental.pallas import tpu as pltpu


def gcn_net_kernel(a_ref, x_ref, w1_ref, b1_ref, w2_ref, b2_ref, o_ref):
    """Fused 2-layer GCN:  relu(A @ (relu(A @ (X @ W1) + b1) @ W2) + b2).

    a_ref : [N, N]   dense adjacency A[dst, src], bf16 (0/1 entries, exact)
    x_ref : [N, K]   node features, f32 (cast to bf16 in-kernel)
    w1_ref: [K, H]   layer-1 weight, pre-transposed [in, out], bf16
    b1_ref: [1, H]   layer-1 bias, f32
    w2_ref: [H, C]   layer-2 weight, pre-transposed [in, out], f32
    b2_ref: [1, C]   layer-2 bias, f32
    o_ref : [N, C]   output node features, f32
    """
    a = a_ref[...]                                                       # [N, N] bf16

    # ---- layer 1:  relu(A @ (X @ W1) + b1)  (reassociated: ~3x fewer FLOPs) ----
    x_bf16 = x_ref[...].astype(jnp.bfloat16)                             # free VPU cast
    xw = jnp.dot(x_bf16, w1_ref[...],
                 preferred_element_type=jnp.float32)                     # [N, H] f32
    h1 = jnp.dot(a, xw.astype(jnp.bfloat16),
                 preferred_element_type=jnp.float32) + b1_ref[...]
    h1 = jnp.maximum(h1, 0.0)                                            # [N, H] f32

    # ---- layer 2:  relu(A @ (h1 @ W2) + b2) ----
    hw = jnp.dot(h1, w2_ref[...], preferred_element_type=jnp.float32)    # [N, C] f32
    h2 = jnp.dot(a, hw.astype(jnp.bfloat16),
                 preferred_element_type=jnp.float32) + b2_ref[...]
    o_ref[...] = jnp.maximum(h2, 0.0).astype(o_ref.dtype)


# ---------------------------------------------------------------------------
# One-time setup: format constants ONCE (outside the per-call forward path).
# ---------------------------------------------------------------------------
def prepare_params(params):
    """Cast/reshape the weights once; forward pass then does no prep work."""
    w1, b1, w2, b2 = params                     # w1: [K, H], w2: [H, C]  ([in, out])
    return (
        w1.astype(jnp.bfloat16),                # big operand -> bf16 once
        b1.reshape(1, -1).astype(jnp.float32),
        w2.astype(jnp.float32),
        b2.reshape(1, -1).astype(jnp.float32),
    )


def prepare_graph(adj):
    """Dense adjacency A[dst, src] -> bf16 once (0/1 values are exact in bf16)."""
    return adj.astype(jnp.bfloat16)


# ---------------------------------------------------------------------------
# Forward: a single pallas_call, nothing else (jit-compiled).
# ---------------------------------------------------------------------------
@functools.partial(jax.jit, static_argnames=())
def net_forward(adj_bf16, features, prepped_params):
    w1, b1, w2, b2 = prepped_params
    n, k = features.shape
    h = w1.shape[1]
    c = w2.shape[1]

    cost = pl.CostEstimate(
        flops=2 * (n * k * h + n * n * h + n * h * c + n * n * c),
        transcendentals=0,
        bytes_accessed=(adj_bf16.size * 2 + features.size * 4 + w1.size * 2
                        + b1.size * 4 + w2.size * 4 + b2.size * 4 + n * c * 4),
    )

    return pl.pallas_call(
        gcn_net_kernel,
        out_shape=jax.ShapeDtypeStruct((n, c), jnp.float32),
        # No grid: tiny problem; full-array VMEM blocks (<150 KB total) fit the
        # default scoped VMEM on v5e/v6e/v7x.
        in_specs=[pl.BlockSpec(memory_space=pltpu.VMEM)] * 6,
        out_specs=pl.BlockSpec(memory_space=pltpu.VMEM),
        cost_estimate=cost,
    )(adj_bf16, features, w1, b1, w2, b2)


# ---------------------------------------------------------------------------
# Init / example data / reference
# ---------------------------------------------------------------------------
def init_params(key, in_feats=1433, hidden=16, out_feats=7, dtype=jnp.float32):
    """Deterministic init mimicking nn.Linear default (uniform +-1/sqrt(fan_in))."""
    k1, k2, k3, k4 = jax.random.split(key, 4)
    lim1 = 1.0 / jnp.sqrt(in_feats)
    lim2 = 1.0 / jnp.sqrt(hidden)
    # stored as [F_in, F_out] (transpose of torch's [out, in]) so kernel does X @ W
    w1 = jax.random.uniform(k1, (in_feats, hidden), dtype, -lim1, lim1)
    b1 = jax.random.uniform(k2, (hidden,), dtype, -lim1, lim1)
    w2 = jax.random.uniform(k3, (hidden, out_feats), dtype, -lim2, lim2)
    b2 = jax.random.uniform(k4, (out_feats,), dtype, -lim2, lim2)
    return w1, b1, w2, b2


def make_graph(key, n_nodes, dtype=jnp.float32):
    """Deterministic random adjacency A[dst, src] (plus self-loops), dense."""
    a = (jax.random.uniform(key, (n_nodes, n_nodes)) < 0.2).astype(dtype)
    a = jnp.maximum(a, jnp.eye(n_nodes, dtype=dtype))  # self-loops
    return a


def reference_forward(adj, features, params):
    """Plain-JAX reference reproducing the kernel's exact casts/reassociation; the only
    remaining difference vs. the kernel is f32 accumulation order."""
    w1, b1, w2, b2 = params
    bf = lambda v: v.astype(jnp.bfloat16).astype(jnp.float32)
    a = bf(adj)                                   # exact (0/1)
    xw = bf(features) @ bf(w1)
    h1 = jnp.maximum(a @ bf(xw) + b1, 0.0)
    hw = h1 @ w2
    h2 = jnp.maximum(a @ bf(hw) + b2, 0.0)
    return h2


if __name__ == "__main__":
    N = 32            # number of nodes (small)
    IN_FEATS = 1433   # fixed by the module
    key = jax.random.PRNGKey(0)
    k_feat, k_graph, k_param = jax.random.split(key, 3)

    features = jax.random.normal(k_feat, (N, IN_FEATS), dtype=jnp.float32)
    adj = make_graph(k_graph, N)
    params = init_params(k_param)

    # one-time constant prep (hoisted out of the forward path)
    adj_bf16 = prepare_graph(adj)
    prepped = prepare_params(params)

    out = jax.block_until_ready(net_forward(adj_bf16, features, prepped))

    ref = reference_forward(adj, features, params)

    assert out.shape == (N, 7)
    assert jnp.allclose(out, ref, atol=2e-3, rtol=2e-3), float(jnp.max(jnp.abs(out - ref)))

    print("KERNEL_OK")
</pallas_src>

<mosaic_0001>
module attributes {stable_mosaic.version = 11 : i64} {
  func.func @gcn_net_kernel(%arg0: memref<32x32xbf16, #tpu.memory_space<vmem>>, %arg1: memref<32x1433xf32, #tpu.memory_space<vmem>>, %arg2: memref<1433x16xbf16, #tpu.memory_space<vmem>>, %arg3: memref<1x16xf32, #tpu.memory_space<vmem>>, %arg4: memref<16x7xf32, #tpu.memory_space<vmem>>, %arg5: memref<1x7xf32, #tpu.memory_space<vmem>>, %arg6: memref<32x7xf32, #tpu.memory_space<vmem>>) attributes {dimension_semantics = [], scalar_prefetch = 0 : i64, scratch_operands = 0 : i64, tpu.core_type = #tpu.core_type<tc>} {
    %c0 = arith.constant 0 : index
    %c0_0 = arith.constant 0 : index
    %0 = vector.load %arg0[%c0, %c0_0] : memref<32x32xbf16, #tpu.memory_space<vmem>>, vector<32x32xbf16>
    %c0_1 = arith.constant 0 : index
    %c0_2 = arith.constant 0 : index
    %1 = vector.load %arg1[%c0_1, %c0_2] : memref<32x1433xf32, #tpu.memory_space<vmem>>, vector<32x1433xf32>
    %2 = arith.truncf %1 : vector<32x1433xf32> to vector<32x1433xbf16>
    %c0_3 = arith.constant 0 : index
    %c0_4 = arith.constant 0 : index
    %3 = vector.load %arg2[%c0_3, %c0_4] : memref<1433x16xbf16, #tpu.memory_space<vmem>>, vector<1433x16xbf16>
    %cst = arith.constant dense<0.000000e+00> : vector<32x16xf32>
    %4 = tpu.matmul %2, %3, %cst {dimension_numbers = #tpu.dot_dimension_numbers<[1], [0], [0], [1], [0, 0, 1, 1], [], []>} : vector<32x1433xbf16>, vector<1433x16xbf16>, vector<32x16xf32> -> vector<32x16xf32>
    %5 = arith.truncf %4 : vector<32x16xf32> to vector<32x16xbf16>
    %cst_5 = arith.constant dense<0.000000e+00> : vector<32x16xf32>
    %6 = tpu.matmul %0, %5, %cst_5 {dimension_numbers = #tpu.dot_dimension_numbers<[1], [0], [0], [1], [0, 0, 1, 1], [], []>} : vector<32x32xbf16>, vector<32x16xbf16>, vector<32x16xf32> -> vector<32x16xf32>
    %c0_6 = arith.constant 0 : index
    %c0_7 = arith.constant 0 : index
    %7 = vector.load %arg3[%c0_6, %c0_7] : memref<1x16xf32, #tpu.memory_space<vmem>>, vector<1x16xf32>
    %8 = vector.broadcast %7 : vector<1x16xf32> to vector<32x16xf32>
    %9 = arith.addf %6, %8 : vector<32x16xf32>
    %cst_8 = arith.constant 0.000000e+00 : f32
    %10 = vector.broadcast %cst_8 : f32 to vector<32x16xf32>
    %11 = arith.maximumf %9, %10 : vector<32x16xf32>
    %c0_9 = arith.constant 0 : index
    %c0_10 = arith.constant 0 : index
    %12 = vector.load %arg4[%c0_9, %c0_10] : memref<16x7xf32, #tpu.memory_space<vmem>>, vector<16x7xf32>
    %cst_11 = arith.constant dense<0.000000e+00> : vector<32x7xf32>
    %13 = tpu.matmul %11, %12, %cst_11 {dimension_numbers = #tpu.dot_dimension_numbers<[1], [0], [0], [1], [0, 0, 1, 1], [], []>} : vector<32x16xf32>, vector<16x7xf32>, vector<32x7xf32> -> vector<32x7xf32>
    %14 = arith.truncf %13 : vector<32x7xf32> to vector<32x7xbf16>
    %cst_12 = arith.constant dense<0.000000e+00> : vector<32x7xf32>
    %15 = tpu.matmul %0, %14, %cst_12 {dimension_numbers = #tpu.dot_dimension_numbers<[1], [0], [0], [1], [0, 0, 1, 1], [], []>} : vector<32x32xbf16>, vector<32x7xbf16>, vector<32x7xf32> -> vector<32x7xf32>
    %c0_13 = arith.constant 0 : index
    %c0_14 = arith.constant 0 : index
    %16 = vector.load %arg5[%c0_13, %c0_14] : memref<1x7xf32, #tpu.memory_space<vmem>>, vector<1x7xf32>
    %17 = vector.broadcast %16 : vector<1x7xf32> to vector<32x7xf32>
    %18 = arith.addf %15, %17 : vector<32x7xf32>
    %cst_15 = arith.constant 0.000000e+00 : f32
    %19 = vector.broadcast %cst_15 : f32 to vector<32x7xf32>
    %20 = arith.maximumf %18, %19 : vector<32x7xf32>
    %c0_16 = arith.constant 0 : index
    %c0_17 = arith.constant 0 : index
    %21 = vector.load %arg6[%c0_16, %c0_17] : memref<32x7xf32, #tpu.memory_space<vmem>>, vector<32x7xf32>
    tpu.vector_store %arg6[%c0_16, %c0_17], %20 {strides = array<i32>} : memref<32x7xf32, #tpu.memory_space<vmem>>, vector<32x7xf32>,
    return
  }
}

</mosaic_0001>

<bundles_post_ra>
// kernel: net_forward.1
= control target key start
LH: loop header
LB: loop body
LE: loop exit
PB: predicated region body
PF: predicated region fallthrough
CT: control target
= control target key end

     0   :  { %vm826_vm0 = vcmask 1043456   ;;  %vm827_vm1 = vcmask 1044480   ;;  %vm819_vm2 = vcmask 203776   ;;  %vm1077_vm3 = vcmask 261120   ;;  %s2159_s2 = inlined_call_operand.vmem [shape: bf16[1433,16], index: 2, kind: input, shape index: {}]   ;;  %s2160_s1 = inlined_call_operand.vmem [shape: f32[32,1433], index: 1, kind: input, shape index: {}]   ;;  %s2161_s3 = inlined_call_operand.vmem [shape: f32[1,16], index: 3, kind: input, shape index: {}]   ;;  %s2162_s0 = inlined_call_operand.vmem [shape: bf16[32,32], index: 0, kind: input, shape index: {}]   ;;  %s2163_s4 = inlined_call_operand.vmem [shape: f32[16,7], index: 4, kind: input, shape index: {}]   ;;  %s2164_s5 = inlined_call_operand.vmem [shape: f32[1,7], index: 5, kind: input, shape index: {}]   ;;  %s2165_s6 = inlined_call_operand.vmem [shape: f32[32,7], index: 6, kind: output, shape index: {}]  }
   0x1   :  { %v1576_v0 = vld [vmem:[%s2159_s2 + $0x38] sm:$0xff]  ;;  %v1575_v4 = vld [vmem:[%s2159_s2 + $0x30] sm:$0xff]  ;;  %v1574_v8 = vld [vmem:[%s2159_s2 + $0x28] sm:$0xff]  ;;  %vm1109_vm4 = vcmask 130048   ;;  %vm1180_vm5 = vcmask 56320  }
   0x2   :  { %v1584_v1 = vld [vmem:[%s2159_s2 + $0x78] sm:$0xff]  ;;  %833 = vmatpush.bf16.msra.mxu0 %v1576_v0  ;;  %v1583_v5 = vld [vmem:[%s2159_s2 + $0x70] sm:$0xff]  ;;  %v1582_v9 = vld [vmem:[%s2159_s2 + $0x68] sm:$0xff] }
   0x3   :  { %v1592_v2 = vld [vmem:[%s2159_s2 + $0xb8] sm:$0xff]  ;;  %852 = vmatpush.bf16.msra.mxu1 %v1584_v1  ;;  %v1591_v6 = vld [vmem:[%s2159_s2 + $0xb0] sm:$0xff]  ;;  %v1590_v10 = vld [vmem:[%s2159_s2 + $0xa8] sm:$0xff] }
   0x4   :  { %v1600_v3 = vld [vmem:[%s2159_s2 + $0xf8] sm:$0xff]  ;;  %871 = vmatpush.bf16.msra.mxu2 %v1592_v2  ;;  %v1599_v7 = vld [vmem:[%s2159_s2 + $0xf0] sm:$0xff]  ;;  %v1598_v11 = vld [vmem:[%s2159_s2 + $0xe8] sm:$0xff] }
   0x5   :  { %890 = vmatpush.bf16.msra.mxu3 %v1600_v3  ;;  %v1573_v12 = vld [vmem:[%s2159_s2 + $0x20] sm:$0xff]  ;;  %v1572_v16 = vld [vmem:[%s2159_s2 + $0x18] sm:$0xff]  ;;  %v1571_v20 = vld [vmem:[%s2159_s2 + $0x10] sm:$0xff] }
   0x6   :  { %834 = vmatpush.bf16.msra.mxu0 %v1575_v4  ;;  %v1581_v13 = vld [vmem:[%s2159_s2 + $0x60] sm:$0xff]  ;;  %v1580_v17 = vld [vmem:[%s2159_s2 + $0x58] sm:$0xff]  ;;  %v1579_v21 = vld [vmem:[%s2159_s2 + $0x50] sm:$0xff] }
   0x7   :  { %853 = vmatpush.bf16.msra.mxu1 %v1583_v5  ;;  %v1589_v14 = vld [vmem:[%s2159_s2 + $0xa0] sm:$0xff]  ;;  %v1588_v18 = vld [vmem:[%s2159_s2 + $0x98] sm:$0xff]  ;;  %v1587_v22 = vld [vmem:[%s2159_s2 + $0x90] sm:$0xff] }
   0x8   :  { %872 = vmatpush.bf16.msra.mxu2 %v1591_v6  ;;  %v1597_v15 = vld [vmem:[%s2159_s2 + $0xe0] sm:$0xff]  ;;  %v1596_v19 = vld [vmem:[%s2159_s2 + $0xd8] sm:$0xff]  ;;  %v1595_v23 = vld [vmem:[%s2159_s2 + $0xd0] sm:$0xff] }
   0x9   :  { %891 = vmatpush.bf16.msra.mxu3 %v1599_v7  ;;  %v1570_v24 = vld [vmem:[%s2159_s2 + $0x8] sm:$0xff]  ;;  %v1569_v28 = vld [vmem:[%s2159_s2] sm:$0xff]  ;;  %v30_v36 = vld [vmem:[%s2160_s1 + $0x10] sm:$0xff] }
   0xa   :  { %835 = vmatpush.bf16.msra.mxu0 %v1574_v8  ;;  %v1578_v25 = vld [vmem:[%s2159_s2 + $0x48] sm:$0xff]  ;;  %v1577_v29 = vld [vmem:[%s2159_s2 + $0x40] sm:$0xff]  ;;  %v42_v37 = vld [vmem:[%s2160_s1 + $0x70] sm:$0xff] }
   0xb   :  { %854 = vmatpush.bf16.msra.mxu1 %v1582_v9  ;;  %v1586_v26 = vld [vmem:[%s2159_s2 + $0x88] sm:$0xff]  ;;  %v1585_v30 = vld [vmem:[%s2159_s2 + $0x80] sm:$0xff]  ;;  %v31_v38 = vld [vmem:[%s2160_s1 + $0x18] sm:$0xff]  ;;  %v78_v44 = vpack.c.bf16 %v42_v37, %v30_v36 }
   0xc   :  { %873 = vmatpush.bf16.msra.mxu2 %v1590_v10  ;;  %v1594_v27 = vld [vmem:[%s2159_s2 + $0xc8] sm:$0xff]  ;;  %v1593_v31 = vld [vmem:[%s2159_s2 + $0xc0] sm:$0xff]  ;;  %v43_v39 = vld [vmem:[%s2160_s1 + $0x78] sm:$0xff] }
   0xd   :  { %892 = vmatpush.bf16.msra.mxu3 %v1598_v11  ;;  %v28_v32 = vld [vmem:[%s2160_s1] sm:$0xff]  ;;  %v29_v34 = vld [vmem:[%s2160_s1 + $0x8] sm:$0xff]  ;;  %v1608_v40 = vld [vmem:[%s2159_s2 + $0x138] sm:$0xff]  ;;  %v79_v45 = vpack.c.bf16 %v43_v39, %v31_v38 }
   0xe   :  { %836 = vmatpush.bf16.msra.mxu0 %v1573_v12  ;;  %v40_v33 = vld [vmem:[%s2160_s1 + $0x60] sm:$0xff]  ;;  %v41_v35 = vld [vmem:[%s2160_s1 + $0x68] sm:$0xff]  ;;  %v1616_v41 = vld [vmem:[%s2159_s2 + $0x178] sm:$0xff] }
   0xf   :  { %855 = vmatpush.bf16.msra.mxu1 %v1581_v13  ;;  %v76_v42 = vpack.c.bf16 %v40_v33, %v28_v32  ;;  %v77_v43 = vpack.c.bf16 %v41_v35, %v29_v34  ;;  %v1624_v46 = vld [vmem:[%s2159_s2 + $0x1b8] sm:$0xff]  ;;  %v1607_v48 = vld [vmem:[%s2159_s2 + $0x130] sm:$0xff]  ;;  %v1606_v52 = vld [vmem:[%s2159_s2 + $0x128] sm:$0xff] }
  0x10   :  { %874 = vmatpush.bf16.msra.mxu2 %v1589_v14  ;;  %v1632_v47 = vld [vmem:[%s2159_s2 + $0x1f8] sm:$0xff]  ;;  %v1615_v49 = vld [vmem:[%s2159_s2 + $0x170] sm:$0xff]  ;;  %v1614_v53 = vld [vmem:[%s2159_s2 + $0x168] sm:$0xff] }
  0x11   :  { %893 = vmatpush.bf16.msra.mxu3 %v1597_v15  ;;  %v1623_v50 = vld [vmem:[%s2159_s2 + $0x1b0] sm:$0xff]  ;;  %v1622_v54 = vld [vmem:[%s2159_s2 + $0x1a8] sm:$0xff]  ;;  %v1605_v56 = vld [vmem:[%s2159_s2 + $0x120] sm:$0xff] }
  0x12   :  { %837 = vmatpush.bf16.msra.mxu0 %v1572_v16  ;;  %v1631_v51 = vld [vmem:[%s2159_s2 + $0x1f0] sm:$0xff]  ;;  %v1630_v55 = vld [vmem:[%s2159_s2 + $0x1e8] sm:$0xff]  ;;  %v1613_v57 = vld [vmem:[%s2159_s2 + $0x160] sm:$0xff] }
  0x13   :  { %856 = vmatpush.bf16.msra.mxu1 %v1580_v17  ;;  %v1621_v58 = vld [vmem:[%s2159_s2 + $0x1a0] sm:$0xff]  ;;  %v53_v62 = vld [vmem:[%s2160_s1 + $0xc8] sm:$0xff]  ;;  %v54_v0 = vld [vmem:[%s2160_s1 + $0xd0] sm:$0xff] }
  0x14   :  { %875 = vmatpush.bf16.msra.mxu2 %v1588_v18  ;;  %v1629_v59 = vld [vmem:[%s2159_s2 + $0x1e0] sm:$0xff]  ;;  %v65_v63 = vld [vmem:[%s2160_s1 + $0x128] sm:$0xff]  ;;  %v66_v1 = vld [vmem:[%s2160_s1 + $0x130] sm:$0xff] }
  0x15   :  { %894 = vmatpush.bf16.msra.mxu3 %v1596_v19  ;;  %v52_v60 = vld [vmem:[%s2160_s1 + $0xc0] sm:$0xff]  ;;  %v55_v2 = vld [vmem:[%s2160_s1 + $0xd8] sm:$0xff]  ;;  %v89_v7 = vpack.c.bf16 %v65_v63, %v53_v62  ;;  %v90_v8 = vpack.c.bf16 %v66_v1, %v54_v0  ;;  %v1603_v12 = vld [vmem:[%s2159_s2 + $0x110] sm:$0xff] }
  0x16   :  { %838 = vmatpush.bf16.msra.mxu0 %v1571_v20  ;;  %v64_v61 = vld [vmem:[%s2160_s1 + $0x120] sm:$0xff]  ;;  %v67_v3 = vld [vmem:[%s2160_s1 + $0x138] sm:$0xff]  ;;  %v1611_v13 = vld [vmem:[%s2159_s2 + $0x150] sm:$0xff] }
  0x17   :  { %857 = vmatpush.bf16.msra.mxu1 %v1579_v21  ;;  %v1604_v4 = vld [vmem:[%s2159_s2 + $0x118] sm:$0xff]  ;;  %v88_v6 = vpack.c.bf16 %v64_v61, %v52_v60  ;;  %v91_v9 = vpack.c.bf16 %v67_v3, %v55_v2  ;;  %v1619_v14 = vld [vmem:[%s2159_s2 + $0x190] sm:$0xff]  ;;  %v1602_v16 = vld [vmem:[%s2159_s2 + $0x108] sm:$0xff] }
  0x18   :  { %876 = vmatpush.bf16.msra.mxu2 %v1587_v22  ;;  %v1612_v5 = vld [vmem:[%s2159_s2 + $0x158] sm:$0xff]  ;;  %v1627_v15 = vld [vmem:[%s2159_s2 + $0x1d0] sm:$0xff]  ;;  %v1610_v17 = vld [vmem:[%s2159_s2 + $0x148] sm:$0xff] }
  0x19   :  { %895 = vmatpush.bf16.msra.mxu3 %v1595_v23  ;;  %v1620_v10 = vld [vmem:[%s2159_s2 + $0x198] sm:$0xff]  ;;  %v1618_v18 = vld [vmem:[%s2159_s2 + $0x188] sm:$0xff]  ;;  %v1601_v20 = vld [vmem:[%s2159_s2 + $0x100] sm:$0xff] }
  0x1a   :  { %839 = vmatpush.bf16.msra.mxu0 %v1570_v24  ;;  %v1628_v11 = vld [vmem:[%s2159_s2 + $0x1d8] sm:$0xff]  ;;  %v1626_v19 = vld [vmem:[%s2159_s2 + $0x1c8] sm:$0xff]  ;;  %v1609_v21 = vld [vmem:[%s2159_s2 + $0x140] sm:$0xff] }
  0x1b   :  { %858 = vmatpush.bf16.msra.mxu1 %v1578_v25  ;;  %v32_v22 = vld [vmem:[%s2160_s1 + $0x20] sm:$0xff]  ;;  %v35_v32 = vld [vmem:[%s2160_s1 + $0x38] sm:$0xff]  ;;  %v1639_v39 = vld [vmem:[%s2159_s2 + $0x230] sm:$0xff] }
  0x1c   :  { %877 = vmatpush.bf16.msra.mxu2 %v1586_v26  ;;  %v1617_v23 = vld [vmem:[%s2159_s2 + $0x180] sm:$0xff]  ;;  %v1640_v26 = vld [vmem:[%s2159_s2 + $0x238] sm:$0xff]  ;;  %v1635_v63 = vld [vmem:[%s2159_s2 + $0x210] sm:$0xff] }
  0x1d   :  { %896 = vmatpush.bf16.msra.mxu3 %v1594_v27  ;;  %v1625_v24 = vld [vmem:[%s2159_s2 + $0x1c0] sm:$0xff]  ;;  %v1648_v27 = vld [vmem:[%s2159_s2 + $0x278] sm:$0xff]  ;;  %v1643_v0 = vld [vmem:[%s2159_s2 + $0x250] sm:$0xff] }
  0x1e   :  { %840 = vmatpush.bf16.msra.mxu0 %v1569_v28  ;;  %v44_v25 = vld [vmem:[%s2160_s1 + $0x80] sm:$0xff]  ;;  %v33_v28 = vld [vmem:[%s2160_s1 + $0x28] sm:$0xff]  ;;  %v47_v33 = vld [vmem:[%s2160_s1 + $0x98] sm:$0xff] }
  0x1f   :  { %859 = vmatpush.bf16.msra.mxu1 %v1577_v29  ;;  %v45_v29 = vld [vmem:[%s2160_s1 + $0x88] sm:$0xff]  ;;  %v1656_v34 = vld [vmem:[%s2159_s2 + $0x2b8] sm:$0xff]  ;;  %v80_v35 = vpack.c.bf16 %v44_v25, %v32_v22  ;;  %v83_v38 = vpack.c.bf16 %v47_v33, %v35_v32  ;;  %v1651_v1 = vld [vmem:[%s2159_s2 + $0x290] sm:$0xff] }
  0x20   :  { %878 = vmatpush.bf16.msra.mxu2 %v1585_v30  ;;  %v34_v30 = vld [vmem:[%s2160_s1 + $0x30] sm:$0xff]  ;;  %v81_v36 = vpack.c.bf16 %v45_v29, %v33_v28  ;;  %v1547_v2 = vld [vmem:[%s2159_s2 + $0x2c8] sm:$0xf]  ;;  %v1658_v3 = vld [vmem:[%s2159_s2 + $0x2c8] sm:$0x10] }
  0x21   :  { %897 = vmatpush.bf16.msra.mxu3 %v1593_v31  ;;  %841 = vmatmul.bf16.vlgmr.msra.gmra.mxu0 %v76_v42  ;;  %v46_v31 = vld [vmem:[%s2160_s1 + $0x90] sm:$0xff]  ;;  %v1638_v42 = vld [vmem:[%s2159_s2 + $0x228] sm:$0xff]  ;;  %v39_v32 = vld [vmem:[%s2160_s1 + $0x58] sm:$0xff] }
  0x22   :  { %909 = vmatpush.bf16.msrb.mxu0 %v1608_v40  ;;  %860 = vmatmul.bf16.vlgmr.msra.gmra.mxu1 %v77_v43  ;;  %v82_v37 = vpack.c.bf16 %v46_v31, %v34_v30  ;;  %v1647_v40 = vld [vmem:[%s2159_s2 + $0x270] sm:$0xff]  ;;  %v1646_v43 = vld [vmem:[%s2159_s2 + $0x268] sm:$0xff]  ;;  %v51_v33 = vld [vmem:[%s2160_s1 + $0xb8] sm:$0xff] }
  0x23   :  { %928 = vmatpush.bf16.msrb.mxu1 %v1616_v41  ;;  %879 = vmatmul.bf16.vlgmr.msra.gmra.mxu2 %v78_v44  ;;  %v1655_v41 = vld [vmem:[%s2159_s2 + $0x2b0] sm:$0xff]  ;;  %v1654_v44 = vld [vmem:[%s2159_s2 + $0x2a8] sm:$0xff] }
  0x24   :  { %898 = vmatmul.bf16.vlgmr.msra.gmra.mxu3 %v79_v45  ;;  %947 = vmatpush.bf16.msrb.mxu2 %v1624_v46  ;;  %v1637_v45 = vld [vmem:[%s2159_s2 + $0x220] sm:$0xff]  ;;  %v50_v22 = vld [vmem:[%s2160_s1 + $0xb0] sm:$0xff]  ;;  %v61_v28 = vld [vmem:[%s2160_s1 + $0x108] sm:$0xff] }
  0x25   :  { %966 = vmatpush.bf16.msrb.mxu3 %v1632_v47  ;;  %v1645_v46 = vld [vmem:[%s2159_s2 + $0x260] sm:$0xff]  ;;  %v73_v29 = vld [vmem:[%s2160_s1 + $0x168] sm:$0xff]  ;;  %v62_v30 = vld [vmem:[%s2160_s1 + $0x110] sm:$0xff] }
  0x26   :  { %910 = vmatpush.bf16.msrb.mxu0 %v1607_v48  ;;  %v1653_v47 = vld [vmem:[%s2159_s2 + $0x2a0] sm:$0xff]  ;;  %v74_v31 = vld [vmem:[%s2160_s1 + $0x170] sm:$0xff] }
  0x27   :  { %929 = vmatpush.bf16.msrb.mxu1 %v1615_v49  ;;  %v56_v48 = vld [vmem:[%s2160_s1 + $0xe0] sm:$0xff] }
  0x28   :  { %948 = vmatpush.bf16.msrb.mxu2 %v1623_v50  ;;  %v68_v49 = vld [vmem:[%s2160_s1 + $0x140] sm:$0xff]  ;;  %v57_v50 = vld [vmem:[%s2160_s1 + $0xe8] sm:$0xff] }
  0x29   :  { %967 = vmatpush.bf16.msrb.mxu3 %v1631_v51  ;;  %v69_v51 = vld [vmem:[%s2160_s1 + $0x148] sm:$0xff] }
  0x2a   :  { %911 = vmatpush.bf16.msrb.mxu0 %v1606_v52  ;;  %v58_v52 = vld [vmem:[%s2160_s1 + $0xf0] sm:$0xff]  ;;  %v93_v60 = vpack.c.bf16 %v69_v51, %v57_v50 }
  0x2b   :  { %930 = vmatpush.bf16.msrb.mxu1 %v1614_v53  ;;  %v70_v53 = vld [vmem:[%s2160_s1 + $0x150] sm:$0xff] }
  0x2c   :  { %949 = vmatpush.bf16.msrb.mxu2 %v1622_v54  ;;  %v59_v54 = vld [vmem:[%s2160_s1 + $0xf8] sm:$0xff]  ;;  %v94_v61 = vpack.c.bf16 %v70_v53, %v58_v52 }
  0x2d   :  { %968 = vmatpush.bf16.msrb.mxu3 %v1630_v55  ;;  %v71_v55 = vld [vmem:[%s2160_s1 + $0x158] sm:$0xff] }
  0x2e   :  { %912 = vmatpush.bf16.msrb.mxu0 %v1605_v56  ;;  %v1636_v56 = vld [vmem:[%s2159_s2 + $0x218] sm:$0xff]  ;;  %v95_v62 = vpack.c.bf16 %v71_v55, %v59_v54 }
  0x2f   :  { %931 = vmatpush.bf16.msrb.mxu1 %v1613_v57  ;;  %v1644_v57 = vld [vmem:[%s2159_s2 + $0x258] sm:$0xff] }
  0x30   :  { %950 = vmatpush.bf16.msrb.mxu2 %v1621_v58  ;;  %v1652_v58 = vld [vmem:[%s2159_s2 + $0x298] sm:$0xff] }
  0x31   :  { %969 = vmatpush.bf16.msrb.mxu3 %v1629_v59  ;;  %846 = vmatmul.bf16.gmra.mxu0 %v88_v6  ;;  %v92_v59 = vpack.c.bf16 %v68_v49, %v56_v48  ;;  %v1672_v6 = vmov 65535  }
  0x32   :  { %913 = vmatpush.bf16.msrb.mxu0 %v1604_v4  ;;  %865 = vmatmul.bf16.gmra.mxu1 %v89_v7  ;;  %v1634_v4 = vld [vmem:[%s2159_s2 + $0x208] sm:$0xff]  ;;  %v828_v7 = vsel %vm826_vm0, 4294967295, %v1672_v6 }
  0x33   :  { %932 = vmatpush.bf16.msrb.mxu1 %v1612_v5  ;;  %884 = vmatmul.bf16.gmra.mxu2 %v90_v8  ;;  %v1642_v5 = vld [vmem:[%s2159_s2 + $0x248] sm:$0xff] }
  0x34   :  { %903 = vmatmul.bf16.gmra.mxu3 %v91_v9  ;;  %951 = vmatpush.bf16.msrb.mxu2 %v1620_v10  ;;  %v1650_v8 = vld [vmem:[%s2159_s2 + $0x288] sm:$0xff]  ;;  %v1548_v9 = vor.u32 %v1658_v3, %v1547_v2  ;;  %v829_v10 = vsel %vm827_vm1, %v828_v7, 0 }
  0x35   :  { %970 = vmatpush.bf16.msrb.mxu3 %v1628_v11  ;;  %v1633_v11 = vld [vmem:[%s2159_s2 + $0x200] sm:$0xff] }
  0x36   :  { %914 = vmatpush.bf16.msrb.mxu0 %v1603_v12  ;;  %v1641_v12 = vld [vmem:[%s2159_s2 + $0x240] sm:$0xff] }
  0x37   :  { %933 = vmatpush.bf16.msrb.mxu1 %v1611_v13  ;;  %v1649_v13 = vld [vmem:[%s2159_s2 + $0x280] sm:$0xff] }
  0x38   :  { %952 = vmatpush.bf16.msrb.mxu2 %v1619_v14  ;;  %v36_v14 = vld [vmem:[%s2160_s1 + $0x40] sm:$0xff] }
  0x39   :  { %971 = vmatpush.bf16.msrb.mxu3 %v1627_v15  ;;  %v48_v15 = vld [vmem:[%s2160_s1 + $0xa0] sm:$0xff] }
  0x3a   :  { %915 = vmatpush.bf16.msrb.mxu0 %v1602_v16  ;;  %v831_v16 = vand.u32 %v1548_v9, %v829_v10 }
  0x3b   :  { %934 = vmatpush.bf16.msrb.mxu1 %v1610_v17  ;;  %v60_v17 = vld [vmem:[%s2160_s1 + $0x100] sm:$0xff] }
  0x3c   :  { %953 = vmatpush.bf16.msrb.mxu2 %v1618_v18  ;;  %v37_v18 = vld [vmem:[%s2160_s1 + $0x48] sm:$0xff] }
  0x3d   :  { %972 = vmatpush.bf16.msrb.mxu3 %v1626_v19  ;;  %v49_v19 = vld [vmem:[%s2160_s1 + $0xa8] sm:$0xff] }
  0x3e   :  { %916 = vmatpush.bf16.msrb.mxu0 %v1601_v20  ;;  %v72_v20 = vld [vmem:[%s2160_s1 + $0x160] sm:$0xff] }
  0x3f   :  { %935 = vmatpush.bf16.msrb.mxu1 %v1609_v21  ;;  %v38_v21 = vld [vmem:[%s2160_s1 + $0x50] sm:$0xff]  ;;  %v96_v25 = vpack.c.bf16 %v72_v20, %v60_v17 }
  0x40   :  { %954 = vmatpush.bf16.msrb.mxu2 %v1617_v23  ;;  %v84_v23 = vpack.c.bf16 %v48_v15, %v36_v14 }
  0x41   :  { %973 = vmatpush.bf16.msrb.mxu3 %v1625_v24  ;;  %917 = vmatmul.bf16.vlgmr.msrb.gmra.mxu0 %v80_v35  ;;  %v85_v24 = vpack.c.bf16 %v49_v19, %v37_v18  ;;  %v98_v35 = vpack.c.bf16 %v74_v31, %v62_v30 }
  0x42   :  { %985 = vmatpush.bf16.msra.mxu0 %v1640_v26  ;;  %936 = vmatmul.bf16.vlgmr.msrb.gmra.mxu1 %v81_v36  ;;  %v87_v36 = vpack.c.bf16 %v51_v33, %v39_v32 }
  0x43   :  { %1004 = vmatpush.bf16.msra.mxu1 %v1648_v27  ;;  %955 = vmatmul.bf16.vlgmr.msrb.gmra.mxu2 %v82_v37  ;;  %v1657_v27 = vld [vmem:[%s2159_s2 + $0x2c0] sm:$0xff]  ;;  %v63_v37 = vld [vmem:[%s2160_s1 + $0x118] sm:$0xff] }
  0x44   :  { %1023 = vmatpush.bf16.msra.mxu2 %v1656_v34  ;;  %974 = vmatmul.bf16.vlgmr.msrb.gmra.mxu3 %v83_v38  ;;  %v97_v34 = vpack.c.bf16 %v73_v29, %v61_v28  ;;  %v75_v38 = vld [vmem:[%s2160_s1 + $0x178] sm:$0xff] }
  0x45   :  { %1659 = vmatpush.bf16.msra.mxu3 %v1640_v26  ;;  %v86_v26 = vpack.c.bf16 %v50_v22, %v38_v21 }
  0x46   :  { %986 = vmatpush.bf16.msra.mxu0 %v1639_v39 }
  0x47   :  { %1005 = vmatpush.bf16.msra.mxu1 %v1647_v40 }
  0x48   :  { %1024 = vmatpush.bf16.msra.mxu2 %v1655_v41 }
  0x49   :  { %1660 = vmatpush.bf16.msra.mxu3 %v1639_v39  ;;  %v99_v39 = vpack.c.bf16 %v75_v38, %v63_v37 }
  0x4a   :  { %987 = vmatpush.bf16.msra.mxu0 %v1638_v42 }
  0x4b   :  { %1006 = vmatpush.bf16.msra.mxu1 %v1646_v43 }
  0x4c   :  { %1025 = vmatpush.bf16.msra.mxu2 %v1654_v44 }
  0x4d   :  { %1661 = vmatpush.bf16.msra.mxu3 %v1638_v42 }
  0x4e   :  { %988 = vmatpush.bf16.msra.mxu0 %v1637_v45 }
  0x4f   :  { %1007 = vmatpush.bf16.msra.mxu1 %v1645_v46 }
  0x50   :  { %1026 = vmatpush.bf16.msra.mxu2 %v1653_v47 }
  0x51   :  { %1662 = vmatpush.bf16.msra.mxu3 %v1637_v45  ;;  %922 = vmatmul.bf16.gmra.mxu0 %v92_v59 }
  0x52   :  { %989 = vmatpush.bf16.msra.mxu0 %v1636_v56  ;;  %941 = vmatmul.bf16.gmra.mxu1 %v93_v60 }
  0x53   :  { %1008 = vmatpush.bf16.msra.mxu1 %v1644_v57  ;;  %960 = vmatmul.bf16.gmra.mxu2 %v94_v61 }
  0x54   :  { %1027 = vmatpush.bf16.msra.mxu2 %v1652_v58  ;;  %979 = vmatmul.bf16.gmra.mxu3 %v95_v62 }
  0x55   :  { %1663 = vmatpush.bf16.msra.mxu3 %v1636_v56 }
  0x56   :  { %990 = vmatpush.bf16.msra.mxu0 %v1635_v63 }
  0x57   :  { %1009 = vmatpush.bf16.msra.mxu1 %v1643_v0 }
  0x58   :  { %1028 = vmatpush.bf16.msra.mxu2 %v1651_v1 }
  0x59   :  { %1664 = vmatpush.bf16.msra.mxu3 %v1635_v63 }
  0x5a   :  { %991 = vmatpush.bf16.msra.mxu0 %v1634_v4 }
  0x5b   :  { %1010 = vmatpush.bf16.msra.mxu1 %v1642_v5 }
  0x5c   :  { %1029 = vmatpush.bf16.msra.mxu2 %v1650_v8 }
  0x5d   :  { %1665 = vmatpush.bf16.msra.mxu3 %v1634_v4 }
  0x5e   :  { %992 = vmatpush.bf16.msra.mxu0 %v1633_v11 }
  0x5f   :  { %1011 = vmatpush.bf16.msra.mxu1 %v1641_v12 }
  0x60   :  { %1030 = vmatpush.bf16.msra.mxu2 %v1649_v13 }
  0x61   :  { %1666 = vmatpush.bf16.msra.mxu3 %v1633_v11  ;;  %993 = vmatmul.bf16.vlgmr.msra.gmra.mxu0 %v84_v23 }
  0x62   :  { %1012 = vmatmul.bf16.vlgmr.msra.gmra.mxu1 %v85_v24 }
  0x63   :  { %1031 = vmatmul.bf16.vlgmr.msra.gmra.mxu2 %v86_v26 }
  0x64   :  { %998 = vmatmul.bf16.vlgmr.msra.gmra.mxu3 %v96_v25 }
  0x65   :  { %1048 = vmatpush.bf16.msrb.mxu3 %v831_v16 }
  0x69   :  { %1049 = vmatpush.bf16.msrb.mxu3 %v1657_v27 }
  0x72   :  { %1017 = vmatmul.bf16.gmra.mxu1 %v97_v34 }
  0x73   :  { %1036 = vmatmul.bf16.gmra.mxu2 %v98_v35 }
  0x74   :  { %1549 = vmatmul.msk.bf16.vlgmr.msrb.gmra.mxu3 %vm819_vm2, %v87_v36 }
  0x84   :  { %1550 = vmatmul.msk.bf16.gmra.mxu3 %vm819_vm2, %v99_v39 }
  0x9e   :  { %v842_v40 = vpop.f32.mrf.mxu0 }
  0x9f   :  { %v861_v41 = vpop.f32.mrf.mxu1 }
  0xa0   :  { %v862_v42 = vadd.f32 %v861_v41, %v842_v40 }
  0xa6   :  { %v880_v43 = vpop.f32.mrf.mxu2  ;;  %v844_v46 = vpop.f32.mrf.mxu0 }
  0xa7   :  { %v899_v44 = vpop.f32.mrf.mxu3  ;;  %v881_v45 = vadd.f32 %v880_v43, %v862_v42  ;;  %v863_v47 = vpop.f32.mrf.mxu1 }
  0xa8   :  { %v864_v49 = vadd.f32 %v863_v47, %v844_v46 }
  0xa9   :  { %v900_v48 = vadd.f32 %v899_v44, %v881_v45 }
  0xae   :  { %v882_v50 = vpop.f32.mrf.mxu2  ;;  %v847_v53 = vpop.f32.mrf.mxu0 }
  0xaf   :  { %v901_v51 = vpop.f32.mrf.mxu3  ;;  %v883_v52 = vadd.f32 %v882_v50, %v864_v49  ;;  %v866_v54 = vpop.f32.mrf.mxu1 }
  0xb0   :  { %v867_v26 = vadd.f32 %v866_v54, %v847_v53 }
  0xb1   :  { %v902_v55 = vadd.f32 %v901_v51, %v883_v52 }
  0xb6   :  { %v885_v56 = vpop.f32.mrf.mxu2  ;;  %v849_v58 = vpop.f32.mrf.mxu0 }
  0xb7   :  { %v904_v57 = vpop.f32.mrf.mxu3  ;;  %v868_v59 = vpop.f32.mrf.mxu1  ;;  %v886_v33 = vadd.f32 %v885_v56, %v867_v26 }
  0xb8   :  { %v869_v27 = vadd.f32 %v868_v59, %v849_v58 }
  0xb9   :  { %v905_v37 = vadd.f32 %v904_v57, %v886_v33 }
  0xbe   :  { %v887_v60 = vpop.f32.mrf.mxu2  ;;  %v918_v62 = vpop.f32.mrf.mxu0 }
  0xbf   :  { %v906_v61 = vpop.f32.mrf.mxu3  ;;  %v919_v63 = vadd.f32 %v918_v62, %v900_v48  ;;  %v937_v0 = vpop.f32.mrf.mxu1  ;;  %v888_v34 = vadd.f32 %v887_v60, %v869_v27 }
  0xc1   :  { %v938_v1 = vadd.f32 %v937_v0, %v919_v63  ;;  %v907_v38 = vadd.f32 %v906_v61, %v888_v34 }
  0xc6   :  { %v956_v2 = vpop.f32.mrf.mxu2  ;;  %v920_v6 = vpop.f32.mrf.mxu0 }
  0xc7   :  { %v975_v3 = vpop.f32.mrf.mxu3  ;;  %v957_v4 = vadd.f32 %v956_v2, %v938_v1  ;;  %v939_v7 = vpop.f32.mrf.mxu1  ;;  %v921_v21 = vadd.f32 %v920_v6, %v902_v55  ;;  %v1567_v6 = vld [vmem:[%s2162_s0] sm:$0xff] }
  0xc9   :  { %v976_v5 = vadd.f32 %v975_v3, %v957_v4  ;;  %v940_v24 = vadd.f32 %v939_v7, %v921_v21  ;;  %v1568_v7 = vld [vmem:[%s2162_s0 + $0x8] sm:$0xff] }
  0xce   :  { %v958_v8 = vpop.f32.mrf.mxu2  ;;  %v923_v10 = vpop.f32.mrf.mxu0 }
  0xcf   :  { %v977_v9 = vpop.f32.mrf.mxu3  ;;  %v942_v11 = vpop.f32.mrf.mxu1  ;;  %v959_v25 = vadd.f32 %v958_v8, %v940_v24  ;;  %v924_v41 = vadd.f32 %v923_v10, %v905_v37  ;;  %v1108_v8 = vld [vmem:[%s2163_s4 + $0x8] sm:$0xff]  ;;  %v1670_v10 = vld [vmem:[%s2161_s3] ss:$0 sm:$0xff] }
  0xd0   :  { %1667 = vmatpush.msrb.mxu1 %v1108_v8 }
  0xd1   :  { %v978_v30 = vadd.f32 %v977_v9, %v959_v25  ;;  %v943_v50 = vadd.f32 %v942_v11, %v924_v41  ;;  %v1107_v9 = vld [vmem:[%s2163_s4] sm:$0xff] }
  0xd2   :  { %1668 = vmatpush.msrb.mxu1 %v1107_v9 }
  0xd6   :  { %v961_v13 = vpop.f32.mrf.mxu2  ;;  %v925_v15 = vpop.f32.mrf.mxu0 }
  0xd7   :  { %v980_v12 = vpop.f32.mrf.mxu3  ;;  %v944_v16 = vpop.f32.mrf.mxu1  ;;  %v926_v42 = vadd.f32 %v925_v15, %v907_v38  ;;  %v962_v53 = vadd.f32 %v961_v13, %v943_v50 }
  0xd9   :  { %v945_v51 = vadd.f32 %v944_v16, %v926_v42  ;;  %v981_v56 = vadd.f32 %v980_v12, %v962_v53 }
  0xde   :  { %v963_v17 = vpop.f32.mrf.mxu2  ;;  %v994_v19 = vpop.f32.mrf.mxu0 }
  0xdf   :  { %v982_v14 = vpop.f32.mrf.mxu3  ;;  %v1013_v20 = vpop.f32.mrf.mxu1  ;;  %v995_v35 = vadd.f32 %v994_v19, %v976_v5  ;;  %v964_v54 = vadd.f32 %v963_v17, %v945_v51 }
  0xe1   :  { %v1014_v39 = vadd.f32 %v1013_v20, %v995_v35  ;;  %v983_v57 = vadd.f32 %v982_v14, %v964_v54 }
  0xe6   :  { %v1032_v22 = vpop.f32.mrf.mxu2  ;;  %v996_v28 = vpop.f32.mrf.mxu0 }
  0xe7   :  { %v999_v18 = vpop.f32.mrf.mxu3  ;;  %v1015_v29 = vpop.f32.mrf.mxu1  ;;  %v997_v36 = vadd.f32 %v996_v28, %v978_v30  ;;  %v1033_v43 = vadd.f32 %v1032_v22, %v1014_v39 }
  0xe8   :  { %v1000_v59 = vadd.f32 %v999_v18, %v981_v56 }
  0xe9   :  { %v1016_v40 = vadd.f32 %v1015_v29, %v997_v36  ;;  %v1671_v29 = vld [vmem:[%s2164_s5] ss:$0 sm:$0xff] }
  0xee   :  { %v1034_v31 = vpop.f32.mrf.mxu2 }
  0xef   :  { %v1001_v23 = vpop.f32.mrf.mxu3  ;;  %v1035_v44 = vadd.f32 %v1034_v31, %v1016_v40  ;;  %v1018_v45 = vpop.f32.mrf.mxu1 }
  0xf0   :  { %v1002_v60 = vadd.f32 %v1001_v23, %v983_v57  ;;  %v1019_v62 = vadd.f32 %v1018_v45, %v1000_v59 }
  0xf6   :  { %v1037_v49 = vpop.f32.mrf.mxu2 }
  0xf7   :  { %v1051_v32 = vpop.f32.mrf.mxu3  ;;  %v1020_v58 = vpop.f32.mrf.mxu1  ;;  %v1038_v0 = vadd.f32 %v1037_v49, %v1019_v62 }
  0xf8   :  { %v1052_v47 = vadd.f32 %v1051_v32, %v1033_v43  ;;  %v1021_v63 = vadd.f32 %v1020_v58, %v1002_v60 }
  0xfe   :  { %v1039_v61 = vpop.f32.mrf.mxu2 }
  0xff   :  { %v1053_v46 = vpop.f32.mrf.mxu3  ;;  %v1040_v1 = vadd.f32 %v1039_v61, %v1021_v63 }
 0x100   :  { %v1054_v48 = vadd.f32 %v1053_v46, %v1035_v44 }
 0x102   :  { %v1061_v52 = vpack.c.bf16 %v1054_v48, %v1052_v47 }
 0x107   :  { %v1056_v55 = vpop.f32.mrf.mxu3 }
 0x108   :  { %v1057_v3 = vadd.f32 %v1056_v55, %v1038_v0 }
 0x10f   :  { %v1058_v2 = vpop.f32.mrf.mxu3 }
 0x110   :  { %v1059_v4 = vadd.f32 %v1058_v2, %v1040_v1 }
 0x112   :  { %v1062_v5 = vpack.c.bf16 %v1059_v4, %v1057_v3 }
 0x114   :  { %1090 = vmatpush.bf16.msrb.mxu0 %v1062_v5 }
 0x118   :  { %1091 = vmatpush.bf16.msrb.mxu0 %v1061_v52 }
 0x11b   :  { %1559 = vmatmul.msk.bf16.vlgmr.msrb.gmra.mxu0 %vm1077_vm3, %v1567_v6 }
 0x11c   :  { %1136 = vmatpush.msra.mxu0 %v1108_v8 }
 0x11e   :  { %1137 = vmatpush.msra.mxu0 %v1107_v9 }
 0x12b   :  { %1560 = vmatmul.msk.bf16.gmra.mxu0 %vm1077_vm3, %v1568_v7 }
 0x198   :  { %v1093_v11 = vpop.f32.mrf.mxu0 }
 0x199   :  { %v1094_v12 = vadd.f32 %v1670_v10, %v1093_v11 }
 0x19b   :  { %v1103_v13 = vmax.f32 %v1094_v12, 0.0 }
 0x19d   :  { %1561 = vmatmul.msk.f32.vlgmr.msra.gmra.mxu0 %vm1109_vm4, %v1103_v13 }
 0x1a0   :  { %v1095_v14 = vpop.f32.mrf.mxu0 }
 0x1a1   :  { %v1096_v15 = vadd.f32 %v1670_v10, %v1095_v14 }
 0x1a3   :  { %v1104_v16 = vmax.f32 %v1096_v15, 0.0 }
 0x1a5   :  { %1562 = vmatmul.msk.f32.vlgmr.msrb.gmra.mxu1 %vm1109_vm4, %v1104_v16 }
 0x1a8   :  { %v1098_v17 = vpop.f32.mrf.mxu0 }
 0x1a9   :  { %v1099_v18 = vadd.f32 %v1670_v10, %v1098_v17 }
 0x1ab   :  { %v1105_v19 = vmax.f32 %v1099_v18, 0.0 }
 0x1ad   :  { %1563 = vmatmul.msk.f32.gmra.mxu1 %vm1109_vm4, %v1105_v19 }
 0x1b0   :  { %v1100_v20 = vpop.f32.mrf.mxu0 }
 0x1b1   :  { %v1101_v21 = vadd.f32 %v1670_v10, %v1100_v20 }
 0x1b3   :  { %v1106_v22 = vmax.f32 %v1101_v21, 0.0 }
 0x1b5   :  { %1564 = vmatmul.msk.f32.gmra.mxu1 %vm1109_vm4, %v1106_v22 }
 0x21a   :  { %v1139_v27 = vpop.f32.mrf.mxu0 }
 0x222   :  { %v1142_v23 = vpop.f32.mrf.mxu1 }
 0x223   :  { %v1151_v28 = vpack.c.bf16 %v1142_v23, %v1139_v27 }
 0x22a   :  { %v1145_v24 = vpop.f32.mrf.mxu1 }
 0x232   :  { %v1148_v25 = vpop.f32.mrf.mxu1 }
 0x233   :  { %v1152_v26 = vpack.c.bf16 %v1148_v25, %v1145_v24 }
 0x235   :  { %1163 = vmatpush.bf16.msrb.mxu2 %v1152_v26 }
 0x239   :  { %1164 = vmatpush.bf16.msrb.mxu2 %v1151_v28 }
 0x23c   :  { %1565 = vmatmul.msk.bf16.vlgmr.msrb.gmra.mxu2 %vm1077_vm3, %v1567_v6 }
 0x24c   :  { %1566 = vmatmul.msk.bf16.gmra.mxu2 %vm1077_vm3, %v1568_v7 }
 0x2bf   :  { %v1166_v30 = vpop.f32.mrf.mxu2 }
 0x2c0   :  { %v1167_v31 = vadd.f32 %v1671_v29, %v1166_v30 }
 0x2c2   :  { %v1176_v32 = vmax.f32 %v1167_v31, 0.0 }
 0x2c4   :  { %1181 = vst.msk [vmem:[%s2165_s6] sm:$0xff] %vm1180_vm5, %v1176_v32 }
 0x2c7   :  { %v1168_v33 = vpop.f32.mrf.mxu2 }
 0x2c8   :  { %v1169_v34 = vadd.f32 %v1671_v29, %v1168_v33 }
 0x2ca   :  { %v1177_v35 = vmax.f32 %v1169_v34, 0.0 }
 0x2cc   :  { %1182 = vst.msk [vmem:[%s2165_s6 + $0x8] sm:$0xff] %vm1180_vm5, %v1177_v35 }
 0x2cf   :  { %v1171_v36 = vpop.f32.mrf.mxu2 }
 0x2d0   :  { %v1172_v37 = vadd.f32 %v1671_v29, %v1171_v36 }
 0x2d2   :  { %v1178_v38 = vmax.f32 %v1172_v37, 0.0 }
 0x2d4   :  { %1183 = vst.msk [vmem:[%s2165_s6 + $0x10] sm:$0xff] %vm1180_vm5, %v1178_v38 }
 0x2d7   :  { %v1173_v39 = vpop.f32.mrf.mxu2 }
 0x2d8   :  { %v1174_v40 = vadd.f32 %v1671_v29, %v1173_v39 }
 0x2da   :  { %v1179_v41 = vmax.f32 %v1174_v40, 0.0 }
 0x2dc   :  { %1184 = vst.msk [vmem:[%s2165_s6 + $0x18] sm:$0xff] %vm1180_vm5, %v1179_v41 }

</bundles_post_ra>
